<compile_context>
chip_gen: v7x
topology: tpu7x:2x2x1
jax: 0.10.0
libtpu: 0.0.40
codegen_flags: <defaults>
</compile_context>

<pallas_src>
import functools

import jax
import jax.numpy as jnp
from jax.experimental import pallas as pl
from jax.experimental.pallas import tpu as pltpu


def _make_link_predictor_kernel(num_layers):
    """Build a fused kernel body for `num_layers` Linear layers (>= 2)."""

    def kernel(*refs):
        xi_ref, xj_ref = refs[0], refs[1]
        o_ref = refs[-1]
        layer_refs = refs[2:-1]                 # (w, b) pairs, num_layers of them

        # Inputs arrive as bf16; upcast before the VPU multiply.
        h = xi_ref[...].astype(jnp.float32) * xj_ref[...].astype(jnp.float32)

        # Hidden layers: weights pre-transposed -> feed MXU directly.
        for l in range(num_layers - 1):
            wt = layer_refs[2 * l][...]          # (in, H)
            b = layer_refs[2 * l + 1][...]       # (1, H)
            h = jnp.dot(h, wt, preferred_element_type=jnp.float32)
            h = jnp.maximum(h + b, 0.0)
            # dropout == identity in eval mode

        # Final layer as W_last @ h^T so the output tile is lane-dense
        # (Cout, tb); the transpose rides the otherwise-idle XLU.
        w_last = layer_refs[-2][...]             # (Cout, H)
        b_last = layer_refs[-1][...]             # (Cout, 1)
        z = jax.lax.dot_general(
            w_last, h,
            dimension_numbers=(((1,), (1,)), ((), ())),
            preferred_element_type=jnp.float32)  # (Cout, tb)
        o_ref[...] = jax.nn.sigmoid(z + b_last).astype(o_ref.dtype)

    return kernel


def _pick_block_b(B, Cin):
    """Largest 128-multiple tile that fits a VMEM budget and leaves >=2 grid steps."""
    # xi + xj, double-buffered, bf16: bytes per padded batch row held in VMEM.
    bytes_per_row = 2 * 2 * Cin * 2
    vmem_budget = 24 << 20                      # conservative even for v7x (64 MiB VMEM)
    cap = max(128, (vmem_budget // bytes_per_row) // 128 * 128)
    for cand in (4096, 2048, 1024, 512, 256, 128):
        if cand <= cap and B >= 2 * cand:
            return cand
    return 128


@functools.partial(jax.jit, static_argnames=("block_b",))
def link_predictor(x_i, x_j, params, *, block_b=None):
    """Fused LinkPredictor forward. x_i, x_j: [B, in_channels] float32 -> [B, Cout]."""
    num_layers = len(params)
    assert num_layers >= 2, "module always has at least 2 Linear layers"
    B, Cin = x_i.shape
    H = params[0][0].shape[0]
    Cout = params[-1][0].shape[0]

    if block_b is None:
        block_b = _pick_block_b(B, Cin)
    if block_b % 128 != 0:
        raise ValueError("block_b must be a multiple of 128 (lane-dense output tile)")

    n_blocks = pl.cdiv(B, block_b)
    Bp = n_blocks * block_b

    # Stream the large batch inputs as bf16 (memory-bound kernel: ~2x fewer bytes).
    xi = x_i.astype(jnp.bfloat16)
    xj = x_j.astype(jnp.bfloat16)
    if Bp != B:
        pad = ((0, Bp - B), (0, 0))
        xi = jnp.pad(xi, pad)
        xj = jnp.pad(xj, pad)

    # One-time layout plumbing outside the kernel.
    weight_args = []
    for (w, b) in params[:-1]:
        weight_args.append(w.T)                  # (in, out) for direct MXU feed
        weight_args.append(b.reshape(1, -1))     # (1, out)
    w_last, b_last = params[-1]
    weight_args.append(w_last)                   # (Cout, H) -- used as lhs of dot_general
    weight_args.append(b_last.reshape(Cout, 1))  # broadcasts over lane-dense output row

    batch_spec = pl.BlockSpec((block_b, Cin), lambda i: (i, 0))
    out_spec = pl.BlockSpec((Cout, block_b), lambda i: (0, i))
    full = lambda s: pl.BlockSpec(s, lambda i, _s=s: (0,) * len(_s))

    out_t = pl.pallas_call(
        _make_link_predictor_kernel(num_layers),
        out_shape=jax.ShapeDtypeStruct((Cout, Bp), jnp.float32),
        grid_spec=pltpu.PrefetchScalarGridSpec(
            num_scalar_prefetch=0,
            grid=(n_blocks,),
            in_specs=[batch_spec, batch_spec]
                     + [full(a.shape) for a in weight_args],
            out_specs=out_spec,
        ),
        compiler_params=pltpu.CompilerParams(
            dimension_semantics=("parallel",)),
    )(xi, xj, *weight_args)

    return out_t.T[:B]                           # (B, Cout)


def init_link_predictor_params(key, in_channels, hidden_channels, out_channels,
                               num_layers):
    """Deterministic PyTorch-style (Kaiming-uniform-ish) Linear init."""
    dims = ([(in_channels, hidden_channels)]
            + [(hidden_channels, hidden_channels)] * (num_layers - 2)
            + [(hidden_channels, out_channels)])
    params = []
    for (fan_in, fan_out) in dims:
        key, kw, kb = jax.random.split(key, 3)
        bound = 1.0 / jnp.sqrt(fan_in)
        w = jax.random.uniform(kw, (fan_out, fan_in), jnp.float32, -bound, bound)
        b = jax.random.uniform(kb, (fan_out,), jnp.float32, -bound, bound)
        params.append((w, b))
    return params


def _reference_forward(x_i, x_j, params):
    x = x_i * x_j
    for (w, b) in params[:-1]:
        x = jnp.maximum(x @ w.T + b, 0.0)
    w, b = params[-1]
    return jax.nn.sigmoid(x @ w.T + b)


if __name__ == "__main__":
    in_channels = 32
    hidden_channels = 32
    out_channels = 1
    num_layers = 3
    batch = 512          # number of candidate links (auto block_b=256 -> grid of 2)

    key = jax.random.PRNGKey(0)
    k_xi, k_xj, k_p = jax.random.split(key, 3)
    x_i = jax.random.normal(k_xi, (batch, in_channels), jnp.float32)
    x_j = jax.random.normal(k_xj, (batch, in_channels), jnp.float32)
    params = init_link_predictor_params(k_p, in_channels, hidden_channels,
                                        out_channels, num_layers)

    out = link_predictor(x_i, x_j, params)
    out = jax.block_until_ready(out)

    # Reference uses the same bf16-rounded inputs the kernel streams from HBM.
    xi_q = x_i.astype(jnp.bfloat16).astype(jnp.float32)
    xj_q = x_j.astype(jnp.bfloat16).astype(jnp.float32)
    ref = _reference_forward(xi_q, xj_q, params)

    assert out.shape == (batch, out_channels)
    assert jnp.allclose(out, ref, atol=2e-3, rtol=2e-3), "mismatch vs JAX reference"

    print("KERNEL_OK")
</pallas_src>

<mosaic_0001>
module attributes {stable_mosaic.version = 11 : i64} {
  func.func @kernel(%arg0: i32, %arg1: memref<256x32xbf16, #tpu.memory_space<vmem>>, %arg2: memref<256x32xbf16, #tpu.memory_space<vmem>>, %arg3: memref<32x32xf32, #tpu.memory_space<vmem>>, %arg4: memref<1x32xf32, #tpu.memory_space<vmem>>, %arg5: memref<32x32xf32, #tpu.memory_space<vmem>>, %arg6: memref<1x32xf32, #tpu.memory_space<vmem>>, %arg7: memref<1x32xf32, #tpu.memory_space<vmem>>, %arg8: memref<1x1xf32, #tpu.memory_space<vmem>>, %arg9: memref<1x256xf32, #tpu.memory_space<vmem>>) attributes {dimension_semantics = [#tpu.dimension_semantics<parallel>], iteration_bounds = array<i64: 2>, scalar_prefetch = 0 : i64, scratch_operands = 0 : i64, tpu.core_type = #tpu.core_type<tc>, window_params = [{transform_indices = @transform_0, window_bounds = array<i64: 256, 32>}, {transform_indices = @transform_1, window_bounds = array<i64: 256, 32>}, {pipeline_mode = #tpu.pipeline_mode<synchronous>, transform_indices = @transform_2, window_bounds = array<i64: 32, 32>}, {pipeline_mode = #tpu.pipeline_mode<synchronous>, transform_indices = @transform_3, window_bounds = array<i64: 1, 32>}, {pipeline_mode = #tpu.pipeline_mode<synchronous>, transform_indices = @transform_4, window_bounds = array<i64: 32, 32>}, {pipeline_mode = #tpu.pipeline_mode<synchronous>, transform_indices = @transform_5, window_bounds = array<i64: 1, 32>}, {pipeline_mode = #tpu.pipeline_mode<synchronous>, transform_indices = @transform_6, window_bounds = array<i64: 1, 32>}, {pipeline_mode = #tpu.pipeline_mode<synchronous>, transform_indices = @transform_7, window_bounds = array<i64: 1, 1>}, {transform_indices = @transform_8, window_bounds = array<i64: 1, 256>}]} {
    %c0 = arith.constant 0 : index
    %c0_0 = arith.constant 0 : index
    %0 = vector.load %arg1[%c0, %c0_0] : memref<256x32xbf16, #tpu.memory_space<vmem>>, vector<256x32xbf16>
    %1 = arith.extf %0 : vector<256x32xbf16> to vector<256x32xf32>
    %c0_1 = arith.constant 0 : index
    %c0_2 = arith.constant 0 : index
    %2 = vector.load %arg2[%c0_1, %c0_2] : memref<256x32xbf16, #tpu.memory_space<vmem>>, vector<256x32xbf16>
    %3 = arith.extf %2 : vector<256x32xbf16> to vector<256x32xf32>
    %4 = arith.mulf %1, %3 : vector<256x32xf32>
    %c0_3 = arith.constant 0 : index
    %c0_4 = arith.constant 0 : index
    %5 = vector.load %arg3[%c0_3, %c0_4] : memref<32x32xf32, #tpu.memory_space<vmem>>, vector<32x32xf32>
    %c0_5 = arith.constant 0 : index
    %c0_6 = arith.constant 0 : index
    %6 = vector.load %arg4[%c0_5, %c0_6] : memref<1x32xf32, #tpu.memory_space<vmem>>, vector<1x32xf32>
    %cst = arith.constant dense<0.000000e+00> : vector<256x32xf32>
    %7 = tpu.matmul %4, %5, %cst {dimension_numbers = #tpu.dot_dimension_numbers<[1], [0], [0], [1], [0, 0, 1, 1], [], []>} : vector<256x32xf32>, vector<32x32xf32>, vector<256x32xf32> -> vector<256x32xf32>
    %8 = vector.broadcast %6 : vector<1x32xf32> to vector<256x32xf32>
    %9 = arith.addf %7, %8 : vector<256x32xf32>
    %cst_7 = arith.constant 0.000000e+00 : f32
    %10 = vector.broadcast %cst_7 : f32 to vector<256x32xf32>
    %11 = arith.maximumf %9, %10 : vector<256x32xf32>
    %c0_8 = arith.constant 0 : index
    %c0_9 = arith.constant 0 : index
    %12 = vector.load %arg5[%c0_8, %c0_9] : memref<32x32xf32, #tpu.memory_space<vmem>>, vector<32x32xf32>
    %c0_10 = arith.constant 0 : index
    %c0_11 = arith.constant 0 : index
    %13 = vector.load %arg6[%c0_10, %c0_11] : memref<1x32xf32, #tpu.memory_space<vmem>>, vector<1x32xf32>
    %cst_12 = arith.constant dense<0.000000e+00> : vector<256x32xf32>
    %14 = tpu.matmul %11, %12, %cst_12 {dimension_numbers = #tpu.dot_dimension_numbers<[1], [0], [0], [1], [0, 0, 1, 1], [], []>} : vector<256x32xf32>, vector<32x32xf32>, vector<256x32xf32> -> vector<256x32xf32>
    %15 = vector.broadcast %13 : vector<1x32xf32> to vector<256x32xf32>
    %16 = arith.addf %14, %15 : vector<256x32xf32>
    %cst_13 = arith.constant 0.000000e+00 : f32
    %17 = vector.broadcast %cst_13 : f32 to vector<256x32xf32>
    %18 = arith.maximumf %16, %17 : vector<256x32xf32>
    %c0_14 = arith.constant 0 : index
    %c0_15 = arith.constant 0 : index
    %19 = vector.load %arg7[%c0_14, %c0_15] : memref<1x32xf32, #tpu.memory_space<vmem>>, vector<1x32xf32>
    %c0_16 = arith.constant 0 : index
    %c0_17 = arith.constant 0 : index
    %20 = vector.load %arg8[%c0_16, %c0_17] : memref<1x1xf32, #tpu.memory_space<vmem>>, vector<1x1xf32>
    %cst_18 = arith.constant dense<0.000000e+00> : vector<1x256xf32>
    %21 = tpu.matmul %19, %18, %cst_18 {dimension_numbers = #tpu.dot_dimension_numbers<[1], [1], [0], [0], [0, 0, 1, 0], [], []>} : vector<1x32xf32>, vector<256x32xf32>, vector<1x256xf32> -> vector<1x256xf32>
    %22 = vector.broadcast %20 : vector<1x1xf32> to vector<1x256xf32>
    %23 = arith.addf %21, %22 : vector<1x256xf32>
    %24 = arith.negf %23 : vector<1x256xf32>
    %25 = math.exp %24 : vector<1x256xf32>
    %cst_19 = arith.constant 1.000000e+00 : f32
    %26 = vector.broadcast %cst_19 : f32 to vector<1x256xf32>
    %27 = arith.addf %26, %25 : vector<1x256xf32>
    %28 = arith.divf %26, %27 : vector<1x256xf32>
    %c0_20 = arith.constant 0 : index
    %c0_21 = arith.constant 0 : index
    %29 = vector.load %arg9[%c0_20, %c0_21] : memref<1x256xf32, #tpu.memory_space<vmem>>, vector<1x256xf32>
    tpu.vector_store %arg9[%c0_20, %c0_21], %28 {strides = array<i32>} : memref<1x256xf32, #tpu.memory_space<vmem>>, vector<1x256xf32>,
    return
  }
  func.func @transform_0(%arg0: i32) -> (i32, i32) {
    %c0_i32 = arith.constant 0 : i32
    %c0_i32_0 = arith.constant 0 : i32
    return %arg0, %c0_i32 : i32, i32
  }
  func.func @transform_1(%arg0: i32) -> (i32, i32) {
    %c0_i32 = arith.constant 0 : i32
    %c0_i32_0 = arith.constant 0 : i32
    return %arg0, %c0_i32 : i32, i32
  }
  func.func @transform_2(%arg0: i32) -> (i32, i32) {
    %c0_i32 = arith.constant 0 : i32
    %c0_i32_0 = arith.constant 0 : i32
    %c0_i32_1 = arith.constant 0 : i32
    return %c0_i32, %c0_i32_0 : i32, i32
  }
  func.func @transform_3(%arg0: i32) -> (i32, i32) {
    %c0_i32 = arith.constant 0 : i32
    %c0_i32_0 = arith.constant 0 : i32
    %c0_i32_1 = arith.constant 0 : i32
    return %c0_i32, %c0_i32_0 : i32, i32
  }
  func.func @transform_4(%arg0: i32) -> (i32, i32) {
    %c0_i32 = arith.constant 0 : i32
    %c0_i32_0 = arith.constant 0 : i32
    %c0_i32_1 = arith.constant 0 : i32
    return %c0_i32, %c0_i32_0 : i32, i32
  }
  func.func @transform_5(%arg0: i32) -> (i32, i32) {
    %c0_i32 = arith.constant 0 : i32
    %c0_i32_0 = arith.constant 0 : i32
    %c0_i32_1 = arith.constant 0 : i32
    return %c0_i32, %c0_i32_0 : i32, i32
  }
  func.func @transform_6(%arg0: i32) -> (i32, i32) {
    %c0_i32 = arith.constant 0 : i32
    %c0_i32_0 = arith.constant 0 : i32
    %c0_i32_1 = arith.constant 0 : i32
    return %c0_i32, %c0_i32_0 : i32, i32
  }
  func.func @transform_7(%arg0: i32) -> (i32, i32) {
    %c0_i32 = arith.constant 0 : i32
    %c0_i32_0 = arith.constant 0 : i32
    %c0_i32_1 = arith.constant 0 : i32
    return %c0_i32, %c0_i32_0 : i32, i32
  }
  func.func @transform_8(%arg0: i32) -> (i32, i32) {
    %c0_i32 = arith.constant 0 : i32
    %c0_i32_0 = arith.constant 0 : i32
    return %c0_i32, %arg0 : i32, i32
  }
}

</mosaic_0001>

<bundles_post_ra>
// kernel: link_predictor.1
= control target key start
LH: loop header
LB: loop body
LE: loop exit
PB: predicated region body
PF: predicated region fallthrough
CT: control target
= control target key end

     0   :  { %s2614_s0 = inlined_call_operand.vmem [shape: bf16[512,32], index: 0, kind: input, shape index: {}]   ;;  %s2615_s1 = inlined_call_operand.vmem [shape: bf16[512,32], index: 1, kind: input, shape index: {}]   ;;  %s2616_s2 = inlined_call_operand.vmem [shape: f32[32,32], index: 2, kind: input, shape index: {}]   ;;  %s2617_s3 = inlined_call_operand.vmem [shape: f32[1,32], index: 3, kind: input, shape index: {}]   ;;  %s2618_s4 = inlined_call_operand.vmem [shape: f32[32,32], index: 4, kind: input, shape index: {}]   ;;  %s2619_s5 = inlined_call_operand.vmem [shape: f32[1,32], index: 5, kind: input, shape index: {}]   ;;  %s2620_s6 = inlined_call_operand.vmem [shape: f32[1,32], index: 6, kind: input, shape index: {}]   ;;  %s2621_s7 = inlined_call_operand.<no memory space> [shape: f32[1,1], index: 7, kind: input, shape index: {}]   ;;  %s2622_s8 = inlined_call_operand.hbm [shape: f32[1,512], index: 8, kind: output, shape index: {}]  }
   0x1   :  { %v13_v0 = vstv %s2621_s7 }
   0x2   :  { %14 = vst [vmem:[#allocation2] sm:$0x1] %v13_v0 }
   0x3   :  { %15 = vsyncpa [#allocation4], 0 }
   0x4   :  { %17 = vsyncpa [#allocation4 + $0x1], 0  ;;  %s2243_s29 = smov 0   ;;  %s2245_s30 = smov 0  }
   0x5   :  { %s2247_s9 = smov 0   ;;  %s2249_s10 = smov 0  }
   0x6 LB: > { %s1521_s7 = sadd.s32 4294967295, %s2190_s10   ;;  %s1522_s11 = sadd.s32 4294967294, %s2190_s10   ;;  %s2190_s10 = sphi %s2249_s10, %s2630_s10   ;;  %s2186_s9 = sphi %s2247_s9, %s2629_s9   ;;  %s2182_s30 = sphi %s2245_s30, %s2628_s30   ;;  %s2178_s29 = sphi %s2243_s29, %s2627_s29  }
   0x7   : > { %s2266_s12 = sadd.s32 1, %s2190_s10   ;;  %s208_s13 = sadd.s32 1, %s2186_s9 }
   0x8   : > { %s205_s14 = ssub.s32 %s2190_s10, %s2266_s12  ;;  %p218_p0 = scmp.ne.s32.totalorder %s2186_s9, %s2182_s30 }
   0x9   : > { %p206_p1 = scmp.eq.s32.totalorder %s205_s14, 0  ;;  %p219_p2 = scmp.eq.s32.totalorder %s1521_s7, 1 }
   0xa   : > { %p224_p3 = scmp.ne.s32.totalorder %s2182_s30, %s2178_s29  ;;  %p225_p4 = scmp.eq.s32.totalorder %s1522_s11, 1 }
   0xb   : > { %s2276_s15 = scalar_select %p206_p1, %s2186_s9, %s208_s13  }
   0xc   : > { %p2278_p5 = por %p219_p2, %p218_p0  ;;  %p2282_p6 = por %p225_p4, %p224_p3 }
   0xd   : > { %p1525_p7 = scmp.ge.s32.totalorder %s2190_s10, 1  ;;  %p279_p8 = scmp.lt.s32.totalorder %s2190_s10, 3 }
   0xf   : > { %p280_p9 = pnand %p1525_p7, %p279_p8 }
  0x10   : > { %v491_v1 = vld [vmem:[%s2616_s2] sm:$0xff] (!%p280_p9)  ;;  %v492_v2 = vld [vmem:[%s2616_s2 + $0x8] sm:$0xff] (!%p280_p9)  ;;  %v493_v3 = vld [vmem:[%s2616_s2 + $0x10] sm:$0xff] (!%p280_p9)  ;;  %s2297_s24 = sshll.u32 (!%p280_p9), %s1521_s7, 5  ;;  %vm502_vm0 = vcmask (!%p280_p9), 261120   ;;  %s2194_s13 = smov (!%p280_p9), [#allocation3]  }
  0x11   : > { %283 = sbr.rel (%p280_p9) target bundleno = 829 (0x33d), region = 52  ;;  %v2014_v4 = vpack.c.bf16 (!%p280_p9), %v492_v2, %v491_v1  ;;  %v494_v5 = vld [vmem:[%s2616_s2 + $0x18] sm:$0xff] (!%p280_p9)  ;;  %p319_p10 = scmp.lt.s32.totalorder (!%p280_p9), %s2297_s24, 63  ;;  %v856_v6 = vld [vmem:[%s2618_s4] sm:$0xff] (!%p280_p9)  ;;  %v857_v7 = vld [vmem:[%s2618_s4 + $0x8] sm:$0xff] (!%p280_p9) }
  0x12   : > { %v2018_v8 = vpack.c.bf16 (!%p280_p9), %v494_v5, %v493_v3  ;;  %v2022_v9 = vpack.c.bf16 (!%p280_p9), %v857_v7, %v856_v6  ;;  %vm2508_vm1 = vmpackc.low (!%p280_p9), %vm502_vm0, %vm502_vm0  ;;  %s2572_s27 = scalar_lea.hbm (!%p280_p9), %s2622_s8, %s2297_s24 }
  0x13   : > { %2015 = vmatprep.subr.bf16.mxu0 (!%p280_p9), %v2014_v4 }
  0x14   : > { %2017 = vmatpush3.bf16.msra.mxu0 (!%p280_p9), %v2014_v4  ;;  %2023 = vmatprep.subr.bf16.mxu1 (!%p280_p9), %v2022_v9 }
  0x15   : > { %2019 = vmatprep.subr.bf16.mxu0 (!%p280_p9), %v2018_v8  ;;  %2025 = vmatpush3.bf16.msra.mxu1 (!%p280_p9), %v2022_v9 }
  0x18   : > { %s320_s7 = scalar_select %p319_p10, %s2297_s24, 63  ;;  %2021 = vmatpush3.bf16.msra.mxu0 %v2018_v8 }
  0x1a   : > { %s1528_s14 = sshll.u32 %s320_s7, 2  ;;  %s2132_s7 = sshll.u32 %s2194_s13, 4  ;;  %s2133_s7 = int_to_ptr.vmem [resolvable:$false] %s2132_s7 }
  0x1b   : > { %s2313_s20 = scalar_lea.vmem %s2614_s0, %s1528_s14  ;;  %s2318_s23 = scalar_lea.vmem %s2615_s1, %s1528_s14 }
  0x1c   : > { %v1639_v10 = vld [vmem:[%s2313_s20] sm:$0xff]   ;;  %v1766_v12 = vld [vmem:[%s2313_s20 + $0x8] sm:$0xff]   ;;  %v1767_v18 = vld [vmem:[%s2313_s20 + $0x10] sm:$0xff]   ;;  %s2134_s14 = scalar_lea.vmem %s2133_s7, 64 }
  0x1d   : > { %v1703_v11 = vld [vmem:[%s2318_s23] sm:$0xff]   ;;  %v1640_v13 = vunpack.c.l.bf16 %v1639_v10  ;;  %v1641_v14 = vunpack.c.h.bf16 %v1639_v10  ;;  %v1781_v17 = vld [vmem:[%s2318_s23 + $0x8] sm:$0xff]   ;;  %v1782_v19 = vld [vmem:[%s2318_s23 + $0x10] sm:$0xff]   ;;  %v1644_v20 = vunpack.c.l.bf16 %v1766_v12  ;;  %v1645_v22 = vunpack.c.h.bf16 %v1766_v12 }
  0x1e   : > { %v1704_v15 = vunpack.c.l.bf16 %v1703_v11  ;;  %v1705_v16 = vunpack.c.h.bf16 %v1703_v11  ;;  %v1708_v21 = vunpack.c.l.bf16 %v1781_v17  ;;  %v1709_v23 = vunpack.c.h.bf16 %v1781_v17  ;;  %v1768_v29 = vld [vmem:[%s2313_s20 + $0x18] sm:$0xff]   ;;  %v1769_v37 = vld [vmem:[%s2313_s20 + $0x20] sm:$0xff]   ;;  %v1770_v45 = vld [vmem:[%s2313_s20 + $0x28] sm:$0xff]  }
  0x1f   : > { %v1648_v26 = vunpack.c.l.bf16 %v1767_v18  ;;  %v1712_v27 = vunpack.c.l.bf16 %v1782_v19  ;;  %v1783_v30 = vld [vmem:[%s2318_s23 + $0x18] sm:$0xff]   ;;  %v1649_v32 = vunpack.c.h.bf16 %v1767_v18  ;;  %v1713_v33 = vunpack.c.h.bf16 %v1782_v19  ;;  %v1784_v38 = vld [vmem:[%s2318_s23 + $0x20] sm:$0xff]   ;;  %v1785_v46 = vld [vmem:[%s2318_s23 + $0x28] sm:$0xff]  }
  0x20   : > { %v459_v24 = vmul.f32 %v1704_v15, %v1640_v13  ;;  %v460_v25 = vmul.f32 %v1705_v16, %v1641_v14  ;;  %v461_v28 = vmul.f32 %v1708_v21, %v1644_v20  ;;  %v462_v31 = vmul.f32 %v1709_v23, %v1645_v22  ;;  %v1771_v53 = vld [vmem:[%s2313_s20 + $0x30] sm:$0xff]   ;;  %v1772_v61 = vld [vmem:[%s2313_s20 + $0x38] sm:$0xff]   ;;  %v1773_v5 = vld [vmem:[%s2313_s20 + $0x40] sm:$0xff]  }
  0x21   : > { %v463_v34 = vmul.f32 %v1712_v27, %v1648_v26  ;;  %v1652_v35 = vunpack.c.l.bf16 %v1768_v29  ;;  %v1716_v36 = vunpack.c.l.bf16 %v1783_v30  ;;  %v464_v39 = vmul.f32 %v1713_v33, %v1649_v32  ;;  %v1786_v54 = vld [vmem:[%s2318_s23 + $0x30] sm:$0xff]   ;;  %v1787_v62 = vld [vmem:[%s2318_s23 + $0x38] sm:$0xff]   ;;  %v1788_v6 = vld [vmem:[%s2318_s23 + $0x40] sm:$0xff]  }
  0x22   : > { %1910 = vmatprep.mubr.msk.f32.mxu0 %vm502_vm0, %v459_v24  ;;  %v1653_v40 = vunpack.c.h.bf16 %v1768_v29  ;;  %v1717_v41 = vunpack.c.h.bf16 %v1783_v30  ;;  %v1656_v43 = vunpack.c.l.bf16 %v1769_v37  ;;  %v1720_v44 = vunpack.c.l.bf16 %v1784_v38  ;;  %v1774_v13 = vld [vmem:[%s2313_s20 + $0x48] sm:$0xff]   ;;  %v1775_v21 = vld [vmem:[%s2313_s20 + $0x50] sm:$0xff]   ;;  %v1776_v29 = vld [vmem:[%s2313_s20 + $0x58] sm:$0xff]  }
  0x23   : > { %1911 = vmatmul.mubr.msk.f32.vlgmr.msra.gmra.mrb[0].mxu0 %vm502_vm0, %v460_v25  ;;  %v465_v42 = vmul.f32 %v1716_v36, %v1652_v35  ;;  %v1657_v48 = vunpack.c.h.bf16 %v1769_v37  ;;  %v1721_v49 = vunpack.c.h.bf16 %v1784_v38  ;;  %v1660_v51 = vunpack.c.l.bf16 %v1770_v45  ;;  %v1789_v14 = vld [vmem:[%s2318_s23 + $0x48] sm:$0xff]   ;;  %v1790_v22 = vld [vmem:[%s2318_s23 + $0x50] sm:$0xff]   ;;  %v1791_v30 = vld [vmem:[%s2318_s23 + $0x58] sm:$0xff]  }
  0x24   : > { %1913 = vmatprep.mubr.msk.f32.mxu0 %vm502_vm0, %v461_v28  ;;  %v466_v47 = vmul.f32 %v1717_v41, %v1653_v40  ;;  %v467_v50 = vmul.f32 %v1720_v44, %v1656_v43  ;;  %v1724_v52 = vunpack.c.l.bf16 %v1785_v46  ;;  %v1661_v56 = vunpack.c.h.bf16 %v1770_v45  ;;  %v1777_v37 = vld [vmem:[%s2313_s20 + $0x60] sm:$0xff]   ;;  %v1778_v45 = vld [vmem:[%s2313_s20 + $0x68] sm:$0xff]  }
  0x25   : > { %v468_v55 = vmul.f32 %v1721_v49, %v1657_v48  ;;  %v1725_v57 = vunpack.c.h.bf16 %v1785_v46  ;;  %v1664_v59 = vunpack.c.l.bf16 %v1771_v53  ;;  %v1728_v60 = vunpack.c.l.bf16 %v1786_v54  ;;  %v1792_v38 = vld [vmem:[%s2318_s23 + $0x60] sm:$0xff]   ;;  %v1793_v46 = vld [vmem:[%s2318_s23 + $0x68] sm:$0xff]  }
  0x26   : > { %v469_v58 = vmul.f32 %v1724_v52, %v1660_v51  ;;  %v1665_v0 = vunpack.c.h.bf16 %v1771_v53  ;;  %v1729_v1 = vunpack.c.h.bf16 %v1786_v54  ;;  %v1668_v3 = vunpack.c.l.bf16 %v1772_v61  ;;  %v1779_v53 = vld [vmem:[%s2313_s20 + $0x70] sm:$0xff]  }
  0x27   : > { %1914 = vmatmul.mubr.msk.f32.gmra.mrb[2].mxu0 %vm502_vm0, %v462_v31  ;;  %v470_v63 = vmul.f32 %v1725_v57, %v1661_v56  ;;  %v471_v2 = vmul.f32 %v1728_v60, %v1664_v59  ;;  %v1732_v4 = vunpack.c.l.bf16 %v1787_v62  ;;  %v1669_v8 = vunpack.c.h.bf16 %v1772_v61  ;;  %v1794_v54 = vld [vmem:[%s2318_s23 + $0x70] sm:$0xff]   ;;  %v1780_v61 = vld [vmem:[%s2313_s20 + $0x78] sm:$0xff]   ;;  %s315_s20 = sand.u32 1, %s2182_s30  }
  0x28   : > { %1916 = vmatprep.mubr.msk.f32.mxu0 %vm502_vm0, %v463_v34  ;;  %v472_v7 = vmul.f32 %v1729_v1, %v1665_v0  ;;  %v1733_v9 = vunpack.c.h.bf16 %v1787_v62  ;;  %v1672_v11 = vunpack.c.l.bf16 %v1773_v5  ;;  %v1736_v12 = vunpack.c.l.bf16 %v1788_v6  ;;  %v1795_v62 = vld [vmem:[%s2318_s23 + $0x78] sm:$0xff]   ;;  %s1526_s21 = sshll.u32 %s315_s20, 1  ;;  %s1437_s28 = scalar_lea.sflag [#allocation4], %s315_s20 }
  0x29   : > { %v473_v10 = vmul.f32 %v1732_v4, %v1668_v3  ;;  %v1673_v16 = vunpack.c.h.bf16 %v1773_v5  ;;  %v1737_v17 = vunpack.c.h.bf16 %v1788_v6  ;;  %v1676_v19 = vunpack.c.l.bf16 %v1774_v13  ;;  %s317_s22 = scalar_lea.vmem [#allocation3], %s1526_s21 }
  0x2a   : > { %v474_v15 = vmul.f32 %v1733_v9, %v1669_v8  ;;  %v475_v18 = vmul.f32 %v1736_v12, %v1672_v11  ;;  %v1740_v20 = vunpack.c.l.bf16 %v1789_v14  ;;  %v1677_v24 = vunpack.c.h.bf16 %v1774_v13  ;;  %v859_v11 = vld [vmem:[%s2618_s4 + $0x18] sm:$0xff]  ;;  %v2393_v13 = vld [vmem:[%s2617_s3] ss:$0 sm:$0xff]  ;;  %s1451_s23 = sshll.u32 %s317_s22, 4  ;;  %s2574_s23 = int_to_ptr.vmem [resolvable:$true] %s1451_s23 }
  0x2b   : > { %1917 = vmatmul.mubr.msk.f32.gmra.mrb[4].mxu0 %vm502_vm0, %v464_v39  ;;  %v476_v23 = vmul.f32 %v1737_v17, %v1673_v16  ;;  %v1741_v25 = vunpack.c.h.bf16 %v1789_v14  ;;  %v1680_v27 = vunpack.c.l.bf16 %v1775_v21  ;;  %v1744_v28 = vunpack.c.l.bf16 %v1790_v22  ;;  %s2128_s11 = scalar_lea.vmem %s2574_s23, 32  ;;  %p2135_p0 = scmp.lt.s32.totalorder %s2574_s23, %s2133_s7 }
  0x2c   : > { %1919 = vmatprep.mubr.msk.f32.mxu0 %vm502_vm0, %v465_v42  ;;  %v477_v26 = vmul.f32 %v1740_v20, %v1676_v19  ;;  %v1681_v32 = vunpack.c.h.bf16 %v1775_v21  ;;  %v1745_v33 = vunpack.c.h.bf16 %v1790_v22  ;;  %v1684_v35 = vunpack.c.l.bf16 %v1776_v29  ;;  %p2129_p11 = scmp.ne.s32.totalorder %s2574_s23, %s2128_s11  ;;  %p2136_p1 = scmp.lt.s32.totalorder %s2134_s14, %s2128_s11 }
  0x2d   : > { %v478_v31 = vmul.f32 %v1741_v25, %v1677_v24  ;;  %v479_v34 = vmul.f32 %v1744_v28, %v1680_v27  ;;  %v1748_v36 = vunpack.c.l.bf16 %v1791_v30  ;;  %v1685_v40 = vunpack.c.h.bf16 %v1776_v29 }
  0x2e   : > { %v480_v39 = vmul.f32 %v1745_v33, %v1681_v32  ;;  %v1749_v41 = vunpack.c.h.bf16 %v1791_v30  ;;  %v1688_v43 = vunpack.c.l.bf16 %v1777_v37  ;;  %v1752_v44 = vunpack.c.l.bf16 %v1792_v38  ;;  %p2130_p12 = pnand %p2129_p11, %p2278_p5  ;;  %p2137_p2 = por %p2136_p1, %p2135_p0 }
  0x2f   : > { %1920 = vmatmul.mubr.msk.f32.gmra.mrb[6].mxu0 %vm502_vm0, %v466_v47  ;;  %v481_v42 = vmul.f32 %v1748_v36, %v1684_v35  ;;  %v1689_v48 = vunpack.c.h.bf16 %v1777_v37  ;;  %v1753_v49 = vunpack.c.h.bf16 %v1792_v38  ;;  %v1692_v51 = vunpack.c.l.bf16 %v1778_v45 }
  0x30   : > { %1922 = vmatprep.mubr.msk.f32.mxu0 %vm502_vm0, %v467_v50  ;;  %v482_v47 = vmul.f32 %v1749_v41, %v1685_v40  ;;  %v483_v50 = vmul.f32 %v1752_v44, %v1688_v43  ;;  %v1756_v52 = vunpack.c.l.bf16 %v1793_v46  ;;  %v1693_v56 = vunpack.c.h.bf16 %v1778_v45  ;;  %p2131_p13 = pneg %p2130_p12 }
  0x31   : > { %v1757_v57 = vunpack.c.h.bf16 %v1793_v46  ;;  %v1696_v59 = vunpack.c.l.bf16 %v1779_v53  ;;  %v1760_v60 = vunpack.c.l.bf16 %v1794_v54  ;;  %v1697_v0 = vunpack.c.h.bf16 %v1779_v53 }
  0x32   : > { %v1761_v1 = vunpack.c.h.bf16 %v1794_v54  ;;  %v1700_v3 = vunpack.c.l.bf16 %v1780_v61  ;;  %v1764_v4 = vunpack.c.l.bf16 %v1795_v62  ;;  %v1701_v6 = vunpack.c.h.bf16 %v1780_v61  ;;  %p2138_p3 = pnand %p2137_p2, %p2131_p13 }
  0x33   : > { %1923 = vmatmul.mubr.msk.f32.gmra.mrb[8].mxu0 %vm502_vm0, %v468_v55  ;;  %v484_v55 = vmul.f32 %v1753_v49, %v1689_v48 }
  0x34   : > { %1925 = vmatprep.mubr.msk.f32.mxu0 %vm502_vm0, %v469_v58  ;;  %v485_v58 = vmul.f32 %v1756_v52, %v1692_v51  ;;  %v488_v5 = vmul.f32 %v1761_v1, %v1697_v0  ;;  %v489_v8 = vmul.f32 %v1764_v4, %v1700_v3 }
  0x37   : > { %1926 = vmatmul.mubr.msk.f32.gmra.mrb[10].mxu0 %vm502_vm0, %v470_v63  ;;  %v486_v63 = vmul.f32 %v1757_v57, %v1693_v56 }
  0x38   : > { %1928 = vmatprep.mubr.msk.f32.mxu0 %vm502_vm0, %v471_v2  ;;  %v487_v2 = vmul.f32 %v1760_v60, %v1696_v59 }
  0x3b   : > { %1929 = vmatmul.mubr.msk.f32.gmra.mrb[12].mxu0 %vm502_vm0, %v472_v7  ;;  %v1765_v7 = vunpack.c.h.bf16 %v1795_v62 }
  0x3c   : > { %1931 = vmatprep.mubr.msk.f32.mxu0 %vm502_vm0, %v473_v10  ;;  %v858_v10 = vld [vmem:[%s2618_s4 + $0x10] sm:$0xff] }
  0x3d   : > { %v490_v9 = vmul.f32 %v1765_v7, %v1701_v6  ;;  %v2026_v12 = vpack.c.bf16 %v859_v11, %v858_v10 }
  0x3f   : > { %1932 = vmatmul.mubr.msk.f32.gmra.mrb[14].mxu0 %vm502_vm0, %v474_v15  ;;  %2027 = vmatprep.subr.bf16.mxu1 %v2026_v12 }
  0x40   : > { %1934 = vmatprep.mubr.msk.f32.mxu0 %vm502_vm0, %v475_v18  ;;  %2029 = vmatpush3.bf16.msra.mxu1 %v2026_v12 }
  0x43   : > { %1935 = vmatmul.mubr.msk.f32.gmra.mrb[16].mxu0 %vm502_vm0, %v476_v23 }
  0x44   : > { %1937 = vmatprep.mubr.msk.f32.mxu0 %vm502_vm0, %v477_v26 }
  0x47   : > { %1938 = vmatmul.mubr.msk.f32.gmra.mrb[18].mxu0 %vm502_vm0, %v478_v31 }
  0x48   : > { %1940 = vmatprep.mubr.msk.f32.mxu0 %vm502_vm0, %v479_v34 }
  0x4b   : > { %1941 = vmatmul.mubr.msk.f32.gmra.mrb[20].mxu0 %vm502_vm0, %v480_v39 }
  0x4c   : > { %1943 = vmatprep.mubr.msk.f32.mxu0 %vm502_vm0, %v481_v42 }
  0x4f   : > { %1944 = vmatmul.mubr.msk.f32.gmra.mrb[22].mxu0 %vm502_vm0, %v482_v47 }
  0x50   : > { %1946 = vmatprep.mubr.msk.f32.mxu0 %vm502_vm0, %v483_v50 }
  0x53   : > { %1947 = vmatmul.mubr.msk.f32.gmra.mrb[24].mxu0 %vm502_vm0, %v484_v55 }
  0x54   : > { %1949 = vmatprep.mubr.msk.f32.mxu0 %vm502_vm0, %v485_v58 }
  0x57   : > { %1950 = vmatmul.mubr.msk.f32.gmra.mrb[26].mxu0 %vm502_vm0, %v486_v63 }
  0x58   : > { %1952 = vmatprep.mubr.msk.f32.mxu0 %vm502_vm0, %v487_v2 }
  0x5b   : > { %1953 = vmatmul.mubr.msk.f32.gmra.mrb[28].mxu0 %vm502_vm0, %v488_v5 }
  0x5c   : > { %1955 = vmatprep.mubr.msk.f32.mxu0 %vm502_vm0, %v489_v8 }
  0x5f   : > { %1956 = vmatmul.mubr.msk.f32.gmra.mrb[30].mxu0 %vm502_vm0, %v490_v9 }
  0xf6   : > { %v1912_v14 = vpop.f32.mrb[0].mxu0 }
  0xf7   : > { %v671_v15 = vadd.f32 %v1912_v14, %v2393_v13  ;;  %v665_v16 = vpop.f32.mrb[1].mxu0 }
  0xf8   : > { %v666_v17 = vadd.f32 %v2393_v13, %v665_v16 }
  0xf9   : > { %v825_v20 = vmax.f32 %v671_v15, 0.0 }
  0xfa   : > { %v824_v18 = vmax.f32 %v666_v17, 0.0  ;;  %v1915_v19 = vpop.f32.mrb[2].mxu0 }
  0xfb   : > { %v681_v21 = vadd.f32 %v1915_v19, %v2393_v13  ;;  %v675_v22 = vpop.f32.mrb[3].mxu0 }
  0xfc   : > { %v676_v23 = vadd.f32 %v2393_v13, %v675_v22  ;;  %1966 = vmatprep.mubr.msk.f32.mxu1 %vm502_vm0, %v824_v18 }
  0xfd   : > { %1967 = vmatmul.mubr.msk.f32.vlgmr.msra.gmra.mrb[0].mxu1 %vm502_vm0, %v825_v20  ;;  %v827_v26 = vmax.f32 %v681_v21, 0.0 }
  0xfe   : > { %v826_v24 = vmax.f32 %v676_v23, 0.0  ;;  %v1918_v25 = vpop.f32.mrb[4].mxu0 }
  0xff   : > { %v691_v27 = vadd.f32 %v1918_v25, %v2393_v13  ;;  %v685_v28 = vpop.f32.mrb[5].mxu0 }
 0x100   : > { %v686_v29 = vadd.f32 %v2393_v13, %v685_v28  ;;  %1969 = vmatprep.mubr.msk.f32.mxu1 %vm502_vm0, %v826_v24 }
 0x101   : > { %1970 = vmatmul.mubr.msk.f32.gmra.mrb[2].mxu1 %vm502_vm0, %v827_v26  ;;  %v829_v32 = vmax.f32 %v691_v27, 0.0 }
 0x102   : > { %v828_v30 = vmax.f32 %v686_v29, 0.0  ;;  %v1921_v31 = vpop.f32.mrb[6].mxu0 }
 0x103   : > { %v701_v33 = vadd.f32 %v1921_v31, %v2393_v13  ;;  %v695_v34 = vpop.f32.mrb[7].mxu0 }
 0x104   : > { %v696_v35 = vadd.f32 %v2393_v13, %v695_v34  ;;  %1972 = vmatprep.mubr.msk.f32.mxu1 %vm502_vm0, %v828_v30 }
 0x105   : > { %1973 = vmatmul.mubr.msk.f32.gmra.mrb[4].mxu1 %vm502_vm0, %v829_v32  ;;  %v831_v38 = vmax.f32 %v701_v33, 0.0 }
 0x106   : > { %v830_v36 = vmax.f32 %v696_v35, 0.0  ;;  %v1924_v37 = vpop.f32.mrb[8].mxu0 }
 0x107   : > { %v711_v39 = vadd.f32 %v1924_v37, %v2393_v13  ;;  %v705_v40 = vpop.f32.mrb[9].mxu0 }
 0x108   : > { %v706_v41 = vadd.f32 %v2393_v13, %v705_v40  ;;  %1975 = vmatprep.mubr.msk.f32.mxu1 %vm502_vm0, %v830_v36 }
 0x109   : > { %1976 = vmatmul.mubr.msk.f32.gmra.mrb[6].mxu1 %vm502_vm0, %v831_v38  ;;  %v833_v44 = vmax.f32 %v711_v39, 0.0 }
 0x10a   : > { %v832_v42 = vmax.f32 %v706_v41, 0.0  ;;  %v1927_v43 = vpop.f32.mrb[10].mxu0 }
 0x10b   : > { %v721_v45 = vadd.f32 %v1927_v43, %v2393_v13  ;;  %v715_v46 = vpop.f32.mrb[11].mxu0 }
 0x10c   : > { %v716_v47 = vadd.f32 %v2393_v13, %v715_v46  ;;  %1978 = vmatprep.mubr.msk.f32.mxu1 %vm502_vm0, %v832_v42 }
 0x10d   : > { %1979 = vmatmul.mubr.msk.f32.gmra.mrb[8].mxu1 %vm502_vm0, %v833_v44  ;;  %v835_v50 = vmax.f32 %v721_v45, 0.0 }
 0x10e   : > { %v834_v48 = vmax.f32 %v716_v47, 0.0  ;;  %v1930_v49 = vpop.f32.mrb[12].mxu0  ;;  %v2462_v47 = vld [vmem:[%s2620_s6] sm:$0x1] }
 0x10f   : > { %v731_v51 = vadd.f32 %v1930_v49, %v2393_v13  ;;  %v725_v52 = vpop.f32.mrb[13].mxu0  ;;  %1900 = vmatprep.mubr.msk.f32.mxu0 %vm502_vm0, %v2462_v47  ;;  %v2192_v49 = vmov 0  }
 0x110   : > { %v726_v53 = vadd.f32 %v2393_v13, %v725_v52  ;;  %1981 = vmatprep.mubr.msk.f32.mxu1 %vm502_vm0, %v834_v48  ;;  %v1221_v48 = vld [vmem:[#allocation2] sm:$0x1]  ;;  %2119 = vset.pattern.permute.xlu0 %v2192_v49 }
 0x111   : > { %1982 = vmatmul.mubr.msk.f32.gmra.mrb[10].mxu1 %vm502_vm0, %v835_v50  ;;  %v837_v56 = vmax.f32 %v731_v51, 0.0  ;;  %1224 = vperm.xlu0 %2119, %v1221_v48  }
 0x112   : > { %v836_v54 = vmax.f32 %v726_v53, 0.0  ;;  %v1933_v55 = vpop.f32.mrb[14].mxu0 }
 0x113   : > { %v741_v57 = vadd.f32 %v1933_v55, %v2393_v13  ;;  %v735_v58 = vpop.f32.mrb[15].mxu0 }
 0x114   : > { %v736_v59 = vadd.f32 %v2393_v13, %v735_v58  ;;  %1984 = vmatprep.mubr.msk.f32.mxu1 %vm502_vm0, %v836_v54 }
 0x115   : > { %1985 = vmatmul.mubr.msk.f32.gmra.mrb[12].mxu1 %vm502_vm0, %v837_v56  ;;  %v839_v62 = vmax.f32 %v741_v57, 0.0 }
 0x116   : > { %v838_v60 = vmax.f32 %v736_v59, 0.0  ;;  %v1936_v61 = vpop.f32.mrb[16].mxu0 }
 0x117   : > { %v751_v63 = vadd.f32 %v1936_v61, %v2393_v13  ;;  %v745_v0 = vpop.f32.mrb[17].mxu0 }
 0x118   : > { %v746_v1 = vadd.f32 %v2393_v13, %v745_v0  ;;  %1987 = vmatprep.mubr.msk.f32.mxu1 %vm502_vm0, %v838_v60 }
 0x119   : > { %1988 = vmatmul.mubr.msk.f32.gmra.mrb[14].mxu1 %vm502_vm0, %v839_v62  ;;  %v841_v4 = vmax.f32 %v751_v63, 0.0 }
 0x11a   : > { %v840_v2 = vmax.f32 %v746_v1, 0.0  ;;  %v1939_v3 = vpop.f32.mrb[18].mxu0 }
 0x11b   : > { %v761_v5 = vadd.f32 %v1939_v3, %v2393_v13  ;;  %v755_v6 = vpop.f32.mrb[19].mxu0 }
 0x11c   : > { %v756_v7 = vadd.f32 %v2393_v13, %v755_v6  ;;  %1990 = vmatprep.mubr.msk.f32.mxu1 %vm502_vm0, %v840_v2 }
 0x11d   : > { %v843_v8 = vmax.f32 %v761_v5, 0.0  ;;  %1991 = vmatmul.mubr.msk.f32.gmra.mrb[16].mxu1 %vm502_vm0, %v841_v4 }
 0x11e   : > { %v842_v9 = vmax.f32 %v756_v7, 0.0  ;;  %v1942_v10 = vpop.f32.mrb[20].mxu0 }
 0x11f   : > { %v771_v11 = vadd.f32 %v1942_v10, %v2393_v13  ;;  %v765_v12 = vpop.f32.mrb[21].mxu0 }
 0x120   : > { %1993 = vmatprep.mubr.msk.f32.mxu1 %vm502_vm0, %v842_v9  ;;  %v766_v14 = vadd.f32 %v2393_v13, %v765_v12 }
 0x121   : > { %1994 = vmatmul.mubr.msk.f32.gmra.mrb[18].mxu1 %vm502_vm0, %v843_v8  ;;  %v845_v15 = vmax.f32 %v771_v11, 0.0 }
 0x122   : > { %v844_v16 = vmax.f32 %v766_v14, 0.0  ;;  %v1945_v17 = vpop.f32.mrb[22].mxu0 }
 0x123   : > { %v781_v18 = vadd.f32 %v1945_v17, %v2393_v13  ;;  %v775_v19 = vpop.f32.mrb[23].mxu0 }
 0x124   : > { %1996 = vmatprep.mubr.msk.f32.mxu1 %vm502_vm0, %v844_v16  ;;  %v776_v20 = vadd.f32 %v2393_v13, %v775_v19 }
 0x125   : > { %1997 = vmatmul.mubr.msk.f32.gmra.mrb[20].mxu1 %vm502_vm0, %v845_v15  ;;  %v847_v21 = vmax.f32 %v781_v18, 0.0 }
 0x126   : > { %v846_v22 = vmax.f32 %v776_v20, 0.0  ;;  %v1948_v23 = vpop.f32.mrb[24].mxu0 }
 0x127   : > { %v791_v24 = vadd.f32 %v1948_v23, %v2393_v13  ;;  %v785_v25 = vpop.f32.mrb[25].mxu0 }
 0x128   : > { %1999 = vmatprep.mubr.msk.f32.mxu1 %vm502_vm0, %v846_v22  ;;  %v786_v26 = vadd.f32 %v2393_v13, %v785_v25 }
 0x129   : > { %2000 = vmatmul.mubr.msk.f32.gmra.mrb[22].mxu1 %vm502_vm0, %v847_v21  ;;  %v849_v27 = vmax.f32 %v791_v24, 0.0 }
 0x12a   : > { %v848_v28 = vmax.f32 %v786_v26, 0.0  ;;  %v1951_v29 = vpop.f32.mrb[26].mxu0 }
 0x12b   : > { %v801_v30 = vadd.f32 %v1951_v29, %v2393_v13  ;;  %v795_v31 = vpop.f32.mrb[27].mxu0 }
 0x12c   : > { %2002 = vmatprep.mubr.msk.f32.mxu1 %vm502_vm0, %v848_v28  ;;  %v796_v32 = vadd.f32 %v2393_v13, %v795_v31 }
 0x12d   : > { %2003 = vmatmul.mubr.msk.f32.gmra.mrb[24].mxu1 %vm502_vm0, %v849_v27  ;;  %v851_v33 = vmax.f32 %v801_v30, 0.0 }
 0x12e   : > { %v850_v34 = vmax.f32 %v796_v32, 0.0  ;;  %v1954_v35 = vpop.f32.mrb[28].mxu0 }
 0x12f   : > { %v811_v36 = vadd.f32 %v1954_v35, %v2393_v13  ;;  %v805_v37 = vpop.f32.mrb[29].mxu0 }
 0x130   : > { %2005 = vmatprep.mubr.msk.f32.mxu1 %vm502_vm0, %v850_v34  ;;  %v806_v38 = vadd.f32 %v2393_v13, %v805_v37 }
 0x131   : > { %2006 = vmatmul.mubr.msk.f32.gmra.mrb[26].mxu1 %vm502_vm0, %v851_v33  ;;  %v853_v39 = vmax.f32 %v811_v36, 0.0 }
 0x132   : > { %v852_v40 = vmax.f32 %v806_v38, 0.0  ;;  %v1957_v41 = vpop.f32.mrb[30].mxu0 }
 0x133   : > { %v821_v42 = vadd.f32 %v1957_v41, %v2393_v13  ;;  %v815_v43 = vpop.f32.mrb[31].mxu0 }
 0x134   : > { %2008 = vmatprep.mubr.msk.f32.mxu1 %vm502_vm0, %v852_v40  ;;  %v816_v44 = vadd.f32 %v2393_v13, %v815_v43  ;;  %v2469_v13 = vld [vmem:[%s2619_s5] ss:$0 sm:$0xff] }
 0x135   : > { %2009 = vmatmul.mubr.msk.f32.gmra.mrb[28].mxu1 %vm502_vm0, %v853_v39  ;;  %v855_v45 = vmax.f32 %v821_v42, 0.0 }
 0x136   : > { %v854_v46 = vmax.f32 %v816_v44, 0.0 }
 0x138   : > { %2011 = vmatprep.mubr.msk.f32.mxu1 %vm502_vm0, %v854_v46 }
 0x139   : > { %2012 = vmatmul.mubr.msk.f32.gmra.mrb[30].mxu1 %vm502_vm0, %v855_v45 }
 0x1d0   : > { %v1968_v50 = vpop.f32.mrb[0].mxu1 }
 0x1d1   : > { %v1035_v51 = vadd.f32 %v1968_v50, %v2469_v13  ;;  %v1029_v52 = vpop.f32.mrb[1].mxu1 }
 0x1d2   : > { %v1030_v53 = vadd.f32 %v2469_v13, %v1029_v52 }
 0x1d3   : > { %v1189_v54 = vmax.f32 %v1035_v51, 0.0 }
 0x1d4   : > { %v1188_v55 = vmax.f32 %v1030_v53, 0.0  ;;  %v1971_v56 = vpop.f32.mrb[2].mxu1 }
 0x1d5   : > { %v1045_v57 = vadd.f32 %v1971_v56, %v2469_v13  ;;  %v1039_v58 = vpop.f32.mrb[3].mxu1 }
 0x1d6   : > { %v2474_v59 = vpack.c.bf16 %v1189_v54, %v1188_v55  ;;  %v1040_v60 = vadd.f32 %v2469_v13, %v1039_v58 }
 0x1d7   : > { %v1191_v61 = vmax.f32 %v1045_v57, 0.0 }
 0x1d8   : > { %v1190_v62 = vmax.f32 %v1040_v60, 0.0  ;;  %v1974_v63 = vpop.f32.mrb[4].mxu1 }
 0x1d9   : > { %v1055_v0 = vadd.f32 %v1974_v63, %v2469_v13  ;;  %v1049_v1 = vpop.f32.mrb[5].mxu1 }
 0x1da   : > { %v2478_v2 = vpack.c.bf16 %v1191_v61, %v1190_v62  ;;  %v1050_v3 = vadd.f32 %v2469_v13, %v1049_v1 }
 0x1db   : > { %v1193_v4 = vmax.f32 %v1055_v0, 0.0 }
 0x1dc   : > { %v1192_v5 = vmax.f32 %v1050_v3, 0.0  ;;  %v1977_v6 = vpop.f32.mrb[6].mxu1 }
 0x1dd   : > { %v1065_v7 = vadd.f32 %v1977_v6, %v2469_v13  ;;  %v1059_v8 = vpop.f32.mrb[7].mxu1 }
 0x1de   : > { %v2482_v9 = vpack.c.bf16 %v1193_v4, %v1192_v5  ;;  %v1060_v10 = vadd.f32 %v2469_v13, %v1059_v8 }
 0x1df   : > { %v1195_v11 = vmax.f32 %v1065_v7, 0.0 }
 0x1e0   : > { %v1194_v12 = vmax.f32 %v1060_v10, 0.0  ;;  %v1980_v14 = vpop.f32.mrb[8].mxu1 }
 0x1e1   : > { %v1075_v15 = vadd.f32 %v1980_v14, %v2469_v13  ;;  %v1069_v16 = vpop.f32.mrb[9].mxu1 }
 0x1e2   : > { %v2486_v17 = vpack.c.bf16 %v1195_v11, %v1194_v12  ;;  %v1070_v18 = vadd.f32 %v2469_v13, %v1069_v16 }
 0x1e3   : > { %v1197_v19 = vmax.f32 %v1075_v15, 0.0 }
 0x1e4   : > { %v1196_v20 = vmax.f32 %v1070_v18, 0.0  ;;  %v1983_v21 = vpop.f32.mrb[10].mxu1 }
 0x1e5   : > { %v1085_v22 = vadd.f32 %v1983_v21, %v2469_v13  ;;  %v1079_v23 = vpop.f32.mrb[11].mxu1 }
 0x1e6   : > { %v2490_v24 = vpack.c.bf16 %v1197_v19, %v1196_v20  ;;  %v1080_v25 = vadd.f32 %v2469_v13, %v1079_v23 }
 0x1e7   : > { %v1199_v26 = vmax.f32 %v1085_v22, 0.0 }
 0x1e8   : > { %v1198_v27 = vmax.f32 %v1080_v25, 0.0  ;;  %v1986_v28 = vpop.f32.mrb[12].mxu1 }
 0x1e9   : > { %v1095_v29 = vadd.f32 %v1986_v28, %v2469_v13  ;;  %v1089_v30 = vpop.f32.mrb[13].mxu1 }
 0x1ea   : > { %v2494_v31 = vpack.c.bf16 %v1199_v26, %v1198_v27  ;;  %v1090_v32 = vadd.f32 %v2469_v13, %v1089_v30 }
 0x1eb   : > { %v1201_v33 = vmax.f32 %v1095_v29, 0.0 }
 0x1ec   : > { %v1200_v34 = vmax.f32 %v1090_v32, 0.0  ;;  %v1989_v35 = vpop.f32.mrb[14].mxu1 }
 0x1ed   : > { %v1105_v36 = vadd.f32 %v1989_v35, %v2469_v13  ;;  %v1099_v37 = vpop.f32.mrb[15].mxu1 }
 0x1ee   : > { %v2498_v38 = vpack.c.bf16 %v1201_v33, %v1200_v34  ;;  %v1100_v39 = vadd.f32 %v2469_v13, %v1099_v37 }
 0x1ef   : > { %v1203_v40 = vmax.f32 %v1105_v36, 0.0 }
 0x1f0   : > { %v1202_v41 = vmax.f32 %v1100_v39, 0.0  ;;  %v1992_v42 = vpop.f32.mrb[16].mxu1 }
 0x1f1   : > { %v1115_v43 = vadd.f32 %v1992_v42, %v2469_v13  ;;  %v1109_v44 = vpop.f32.mrb[17].mxu1 }
 0x1f2   : > { %v2502_v45 = vpack.c.bf16 %v1203_v40, %v1202_v41  ;;  %v1110_v46 = vadd.f32 %v2469_v13, %v1109_v44 }
 0x1f3   : > { %v1205_v48 = vmax.f32 %v1115_v43, 0.0 }
 0x1f4   : > { %v1204_v49 = vmax.f32 %v1110_v46, 0.0  ;;  %v1995_v50 = vpop.f32.mrb[18].mxu1 }
 0x1f5   : > { %v1125_v51 = vadd.f32 %v1995_v50, %v2469_v13  ;;  %v1119_v52 = vpop.f32.mrb[19].mxu1 }
 0x1f6   : > { %v2030_v54 = vpack.c.bf16 %v1205_v48, %v1204_v49  ;;  %v1120_v55 = vadd.f32 %v2469_v13, %v1119_v52 }
 0x1f7   : > { %v1207_v56 = vmax.f32 %v1125_v51, 0.0 }
 0x1f8   : > { %v1206_v57 = vmax.f32 %v1120_v55, 0.0  ;;  %2032 = vmatprep.subr.msk.bf16.mxu0 %vm2508_vm1, %v2030_v54  ;;  %v1998_v58 = vpop.f32.mrb[20].mxu1 }
 0x1f9   : > { %2035 = vmatpush3.bf16.xpose.msk.msra.mxu0 %vm2508_vm1, %v2474_v59  ;;  %v1135_v60 = vadd.f32 %v1998_v58, %v2469_v13  ;;  %v1129_v61 = vpop.f32.mrb[21].mxu1 }
 0x1fa   : > { %v2036_v62 = vpack.c.bf16 %v1207_v56, %v1206_v57  ;;  %v1130_v63 = vadd.f32 %v2469_v13, %v1129_v61 }
 0x1fb   : > { %v1209_v0 = vmax.f32 %v1135_v60, 0.0 }
 0x1fc   : > { %2038 = vmatprep.subr.msk.bf16.mxu0 %vm2508_vm1, %v2036_v62  ;;  %v1208_v1 = vmax.f32 %v1130_v63, 0.0  ;;  %v2001_v3 = vpop.f32.mrb[22].mxu1 }
 0x1fd   : > { %v1145_v4 = vadd.f32 %v2001_v3, %v2469_v13  ;;  %v1139_v5 = vpop.f32.mrb[23].mxu1 }
 0x1fe   : > { %v2042_v6 = vpack.c.bf16 %v1209_v0, %v1208_v1  ;;  %v1140_v7 = vadd.f32 %v2469_v13, %v1139_v5 }
 0x1ff   : > { %v1211_v8 = vmax.f32 %v1145_v4, 0.0 }
 0x200   : > { %v1210_v59 = vmax.f32 %v1140_v7, 0.0  ;;  %v2004_v10 = vpop.f32.mrb[24].mxu1 }
 0x201   : > { %2041 = vmatpush3.bf16.xpose.msk.msra.mxu0 %vm2508_vm1, %v2478_v2  ;;  %v1155_v11 = vadd.f32 %v2004_v10, %v2469_v13  ;;  %v1149_v12 = vpop.f32.mrb[25].mxu1 }
 0x202   : > { %2044 = vmatprep.subr.msk.bf16.mxu0 %vm2508_vm1, %v2042_v6  ;;  %v2048_v14 = vpack.c.bf16 %v1211_v8, %v1210_v59  ;;  %v1150_v15 = vadd.f32 %v2469_v13, %v1149_v12 }
 0x203   : > { %v1213_v16 = vmax.f32 %v1155_v11, 0.0 }
 0x204   : > { %v1212_v18 = vmax.f32 %v1150_v15, 0.0  ;;  %v2007_v19 = vpop.f32.mrb[26].mxu1 }
 0x205   : > { %v1165_v20 = vadd.f32 %v2007_v19, %v2469_v13  ;;  %v1159_v21 = vpop.f32.mrb[27].mxu1 }
 0x206   : > { %v2054_v22 = vpack.c.bf16 %v1213_v16, %v1212_v18  ;;  %v1160_v23 = vadd.f32 %v2469_v13, %v1159_v21 }
 0x207   : > { %v1215_v25 = vmax.f32 %v1165_v20, 0.0 }
 0x208   : > { %v1214_v2 = vmax.f32 %v1160_v23, 0.0  ;;  %v2010_v26 = vpop.f32.mrb[28].mxu1 }
 0x209   : > { %2047 = vmatpush3.bf16.xpose.msk.msra.mxu0 %vm2508_vm1, %v2482_v9  ;;  %v1175_v27 = vadd.f32 %v2010_v26, %v2469_v13  ;;  %v1169_v28 = vpop.f32.mrb[29].mxu1 }
 0x20a   : > { %2050 = vmatprep.subr.msk.bf16.mxu0 %vm2508_vm1, %v2048_v14  ;;  %v2060_v29 = vpack.c.bf16 %v1215_v25, %v1214_v2  ;;  %v1170_v30 = vadd.f32 %v2469_v13, %v1169_v28 }
 0x20b   : > { %v1217_v32 = vmax.f32 %v1175_v27, 0.0 }
 0x20c   : > { %v1216_v33 = vmax.f32 %v1170_v30, 0.0  ;;  %v2013_v34 = vpop.f32.mrb[30].mxu1 }
 0x20d   : > { %v1185_v35 = vadd.f32 %v2013_v34, %v2469_v13  ;;  %v1179_v36 = vpop.f32.mrb[31].mxu1 }
 0x20e   : > { %v2066_v37 = vpack.c.bf16 %v1217_v32, %v1216_v33  ;;  %v1180_v39 = vadd.f32 %v2469_v13, %v1179_v36  ;;  %v1227_v13 = vlaneseq }
 0x20f   : > { %v1219_v40 = vmax.f32 %v1185_v35, 0.0 }
 0x210   : > { %v1218_v9 = vmax.f32 %v1180_v39, 0.0  ;;  %vm1433_vm2 = vcmp.lt.s32.totalorder %v1227_v13, 256 }
 0x211   : > { %2053 = vmatpush3.bf16.xpose.msk.msra.mxu0 %vm2508_vm1, %v2486_v17  ;;  %v1228_v17 = vshrl.u32 %v1227_v13, 7 }
 0x212   : > { %2056 = vmatprep.subr.msk.bf16.mxu0 %vm2508_vm1, %v2054_v22  ;;  %v2072_v41 = vpack.c.bf16 %v1219_v40, %v1218_v9 }
 0x219   : > { %2059 = vmatpush3.bf16.xpose.msk.msra.mxu0 %vm2508_vm1, %v2490_v24  ;;  %v1229_v24 = vsub.s32 0, %v1228_v17 }
 0x21a   : > { %2062 = vmatprep.subr.msk.bf16.mxu0 %vm2508_vm1, %v2060_v29 }
 0x221   : > { %2065 = vmatpush3.bf16.xpose.msk.msra.mxu0 %vm2508_vm1, %v2494_v31  ;;  %v1225_v31 = vpop.permute.xlu0 %1224 }
 0x222   : > { %2068 = vmatprep.subr.msk.bf16.mxu0 %vm2508_vm1, %v2066_v37  ;;  %v1230_v42 = vrot.slane %v1225_v31, %v1229_v24 }
 0x229   : > { %2071 = vmatpush3.bf16.xpose.msk.msra.mxu0 %vm2508_vm1, %v2498_v38 }
 0x22a   : > { %2074 = vmatprep.subr.msk.bf16.mxu0 %vm2508_vm1, %v2072_v41 }
 0x231   : > { %2077 = vmatpush3.bf16.xpose.msk.msra.mxu0 %vm2508_vm1, %v2502_v45 }
 0x238   : > { %1901 = vmatmul.mubr.msk.f32.vlgmr.msra.gmra.mrb[32].mxu0 %vm502_vm0, %v2462_v47  ;;  %v2193_v47 = vmov 1966171168  }
 0x239   : > { %v1417_v53 = vunpack.c.l.s4 %v2193_v47 }
 0x23b   : > { %v1418_v54 = vunpack.c.0.s8 %v1417_v53 }
 0x23d   : > { %v1421_v56 = vsub.s32 %v1418_v54, %v1228_v17 }
 0x30b   : > { %v1396_v43 = vpop.f32.mrb[32].mxu0 }
 0x30c   : > { %v1397_v44 = vadd.f32 %v1396_v43, %v1230_v42  ;;  %v1398_v46 = vpop.f32.mrb[33].mxu0 }
 0x30d   : > { %v1399_v38 = vadd.f32 %v1398_v46, %v1230_v42 }
 0x30e   : > { %v1630_v48 = vmul.f32 -1.442695, %v1397_v44 }
 0x30f   : > { %v1631_v49 = vmul.f32 -1.442695, %v1399_v38 }
 0x310   : > { %2120 = vpow2.f32 %v1630_v48 }
 0x311   : > { %2122 = vpow2.f32 %v1631_v49 }
 0x31a   : > { %v2121_v50 = vpop.eup %2120 }
 0x31b   : > { %v2123_v51 = vpop.eup %2122  ;;  %v1407_v45 = vadd.f32 1.0, %v2121_v50 }
 0x31c   : > { %v1408_v52 = vadd.f32 1.0, %v2123_v51 }
 0x31d   : > { %2124 = vrcp.f32 %v1407_v45 }
 0x31e   : > { %2126 = vrcp.f32 %v1408_v52 }
 0x327   : > { %v2125_v55 = vpop.eup %2124 }
 0x328   : > { %v2127_v57 = vpop.eup %2126 }
 0x329   : > { %v1415_v58 = vcombine.low %v2125_v55, %v2127_v57 }
 0x32b   : > { %v1422_v60 = vrot.slane %v1415_v58, %v1421_v56 }
 0x32d   : > { %v1429_v61 = vrot.slane %v1422_v60, %v1421_v56 }
 0x32f   : > { %1435 = vst.msk [vmem:[%s317_s22] sm:$0x3] %vm1433_vm2, %v1429_v61 }
 0x330   : > { %2141 = shalt.err (!%p2138_p3)
}
 0x331   : > { %s2142_s24 = scalar_lea.hbm %s2572_s27, 32  ;;  %s2146_s20 = scalar_lea.hbm %s2622_s8, 64 }
 0x332   : > { %p2143_p4 = scmp.ne.s32.totalorder %s2572_s27, %s2142_s24  ;;  %p2147_p9 = scmp.lt.u32.totalorder %s2572_s27, %s2622_s8 }
 0x333   : > { %p2148_p10 = scmp.lt.u32.totalorder %s2146_s20, %s2142_s24  ;;  %p2150_p12 = scmp.lt.u32.totalorder %s2142_s24, %s2572_s27 }
 0x334   : > { %p2144_p7 = pnand %p2143_p4, %p2278_p5 }
 0x335   : > { %p2149_p11 = por %p2148_p10, %p2147_p9 }
 0x336   : > { %p2145_p8 = pneg %p2144_p7 }
 0x337   : > { %p2151_p13 = por %p2150_p12, %p2149_p11 }
 0x339   : > { %p2152_p0 = pnand %p2151_p13, %p2145_p8 }
 0x33b   : > { %2155 = shalt.err (!%p2152_p0)
}
 0x33c   : > { %2078 = dma.vmem_to_hbm [thread:$0]  (%p2278_p5), %s2574_s23, 32, %s2572_s27, %s1437_s28  }
 0x33d PF: > { %p2084_p1 = scmp.ge.s32.totalorder %s2190_s10, 2  ;;  %s1463_s25 = sand.u32 1, %s2178_s29  }
 0x33e   : > { %s1464_s26 = scalar_lea.sflag [#allocation4], %s1463_s25 }
 0x33f   : > { %p2081_p2 = pnand %p2084_p1, %p2282_p6 }
 0x341   : > { %2173 = dma.done.wait (!%p2081_p2), %s1464_s26, 32  }
 0x342   : > { %2175 = vsyncadd (!%p2081_p2), %s1464_s26, 4294967264  ;;  %p20_p3 = scmp.ge.s32.totalorder %s2266_s12, 4   ;;  %s2627_s29 = smov %s2182_s30 }
 0x343   : > { %s2628_s30 = smov %s2186_s9  ;;  %s2629_s9 = smov %s2276_s15 }
 0x344   : > { %s2630_s10 = smov %s2266_s12  ;;  %22 = sbr.rel (!%p20_p3) target bundleno = 6 (0x6), region = 90 }
 0x34b   :  { %1469 = vsyncpa [#allocation4], 1 }
 0x34c   :  { %1471 = vsyncpa [#allocation4 + $0x1], 1 }

</bundles_post_ra>
